<compile_context>
chip_gen: v6e
topology: v6e:2x2x1
jax: 0.10.0
libtpu: 0.0.40
codegen_flags: <defaults>
</compile_context>

<pallas_src>
import math
from functools import partial

import jax
import jax.numpy as jnp
from jax.experimental import pallas as pl
from jax.experimental.pallas import tpu as pltpu


def _cnf_kernel(x_ref, noise_ref, w1xT_ref, w2_ref, w2T_ref, b1_ref, b2_ref,
                dx_ref, negdiv_ref):
    x = x_ref[...].astype(jnp.float32)          # (TB, D)
    eps = noise_ref[...].astype(jnp.float32)    # (TB, D)

    w1xT = w1xT_ref[...]                        # (D, H)  == W1[:, 1:].T  (resident)
    w2 = w2_ref[...]                            # (D, H)  == W2           (resident)
    w2T = w2T_ref[...]                          # (H, D)  == W2.T         (resident)

    # ---- stage 1: three K=D dots (shared RHS for x / eps through W1x^T) ----
    a = jnp.dot(x, w1xT, preferred_element_type=jnp.float32) + b1_ref[...]   # (TB, H)
    u = jnp.dot(eps, w1xT, preferred_element_type=jnp.float32)               # eps @ W1x^T
    g = jnp.dot(eps, w2, preferred_element_type=jnp.float32)                 # eps @ W2

    h = jnp.tanh(a)                  # one tanh per element (EUP)
    gp = g * (1.0 - h * h)           # VJP through tanh (VPU)

    # ---- stage 2: single K=H dot for dx; -div contracted elementwise over H ----
    dx = jnp.dot(h, w2T, preferred_element_type=jnp.float32) + b2_ref[...]   # (TB, D)
    dx_ref[...] = dx.astype(dx_ref.dtype)

    negdiv_ref[...] = (-jnp.sum(gp * u, axis=1, keepdims=True)
                       ).astype(negdiv_ref.dtype)


def _round_up(a, m):
    return ((a + m - 1) // m) * m


def _pick_tile(B, D, H, *, target_block_bytes=2 << 20, vmem_budget=40 << 20):
    """Batch rows per grid step + a rough VMEM-footprint estimate (bytes)."""
    def est(tb):
        io = (2 * 2 + 2) * tb * D * 4 + 2 * tb * 4      # double-buffered x/eps/dx + negdiv
        inter = 5 * tb * H * 4 + 2 * tb * D * 4          # a, u, g, h, gp + input casts
        w = 2 * (3 * D * H + 2 * (D + H)) * 4            # resident weights (pessimistic x2)
        return io + inter + w

    if B <= 8:
        return B, est(max(B, 1))
    bp = _round_up(B, 8)
    tb = max(8, min((target_block_bytes // (4 * D)) // 8 * 8, bp))
    if bp >= 16:
        # Guarantee >= 2 grid steps so the "parallel" batch axis can feed both
        # TensorCores on v7x.
        tb = min(tb, _round_up((B + 1) // 2, 8))
    while tb > 8 and est(tb) > vmem_budget:
        tb = max(8, ((tb // 2) // 8) * 8)
    return tb, est(tb)


def prepare_cnf_weights(w1, b1, w2, b2):
    """Hoisted weight prep — call once per ODE solve, not per f-eval."""
    f32 = jnp.float32
    return dict(
        w1t=w1[:, 0].astype(f32),                     # (H,)   time column of W1
        w1xT=jnp.transpose(w1[:, 1:]).astype(f32),    # (D, H) x-columns, pre-transposed
        w2=w2.astype(f32),                            # (D, H)
        w2T=jnp.transpose(w2).astype(f32),            # (H, D)
        b1=b1.astype(f32),                            # (H,)
        b2=b2.astype(f32).reshape(1, -1),             # (1, D)
    )


@jax.jit
def ode_func_with_logdet(t, x, noise, weights):
    """One CNF f-eval.  t: scalar, x/noise: (B, D).  Returns (dx (B,D), -div (B,))."""
    B, D = x.shape
    H = weights["w1t"].shape[0]

    # Only the t-dependent bias fold is recomputed per step (fuses under jit).
    b1_eff = (jnp.asarray(t, jnp.float32) * weights["w1t"]
              + weights["b1"]).reshape(1, H)

    TB, vmem_est = _pick_tile(B, D, H)
    grid = (pl.cdiv(B, TB),)
    vmem_limit = int(min(max(vmem_est + (8 << 20), 32 << 20), 48 << 20))

    row_spec = pl.BlockSpec((TB, D), lambda i: (i, 0))
    const = lambda shape: pl.BlockSpec(shape, lambda i: (0, 0))

    dx, negdiv = pl.pallas_call(
        _cnf_kernel,
        out_shape=(
            jax.ShapeDtypeStruct((B, D), x.dtype),
            jax.ShapeDtypeStruct((B, 1), jnp.float32),
        ),
        grid_spec=pltpu.PrefetchScalarGridSpec(
            num_scalar_prefetch=0,
            grid=grid,
            in_specs=[
                row_spec,                 # x      (batch-tiled, partial last block OK)
                row_spec,                 # noise
                const((D, H)),            # W1x^T  (resident)
                const((D, H)),            # W2     (resident)
                const((H, D)),            # W2^T   (resident)
                const((1, H)),            # b1_eff (t folded in)
                const((1, D)),            # b2
            ],
            out_specs=(
                pl.BlockSpec((TB, D), lambda i: (i, 0)),   # dx
                pl.BlockSpec((TB, 1), lambda i: (i, 0)),   # -div
            ),
        ),
        compiler_params=pltpu.CompilerParams(
            dimension_semantics=("parallel",),
            vmem_limit_bytes=vmem_limit,
        ),
    )(x, noise, weights["w1xT"], weights["w2"], weights["w2T"],
      b1_eff, weights["b2"])

    return dx, negdiv[:, 0]


def _reference(t, x, noise, w1, b1, w2, b2):
    """Pure-JAX reference mirroring the PyTorch autograd path."""
    def f(xx):
        B = xx.shape[0]
        z = jnp.concatenate([jnp.full((B, 1), t, xx.dtype), xx], axis=-1)
        h = jnp.tanh(z @ w1.T + b1)
        return h @ w2.T + b2

    dx = f(x)
    _, vjp_fn = jax.vjp(f, x)
    (vjp,) = vjp_fn(noise)
    div = jnp.sum(vjp * noise, axis=1)
    return dx, -div


if __name__ == "__main__":
    B, D, H = 8, 32, 64
    key = jax.random.PRNGKey(0)
    k_x, k_n, k_w1, k_b1, k_w2, k_b2 = jax.random.split(key, 6)

    x = jax.random.normal(k_x, (B, D), jnp.float32)
    t = jnp.float32(0.37)
    # noise ~ randn_like(x): drawn in host-side glue (deterministic for the test).
    noise = jax.random.normal(k_n, (B, D), jnp.float32)

    # Deterministic "PyTorch-Linear-style" uniform init.
    bound1 = 1.0 / math.sqrt(D + 1)
    w1 = jax.random.uniform(k_w1, (H, D + 1), jnp.float32, -bound1, bound1)
    b1 = jax.random.uniform(k_b1, (H,), jnp.float32, -bound1, bound1)
    bound2 = 1.0 / math.sqrt(H)
    w2 = jax.random.uniform(k_w2, (D, H), jnp.float32, -bound2, bound2)
    b2 = jax.random.uniform(k_b2, (D,), jnp.float32, -bound2, bound2)

    weights = prepare_cnf_weights(w1, b1, w2, b2)   # hoisted: once per ODE solve
    dx, neg_div = ode_func_with_logdet(t, x, noise, weights)
    jax.block_until_ready((dx, neg_div))

    dx_ref, neg_div_ref = _reference(t, x, noise, w1, b1, w2, b2)
    assert dx.shape == (B, D) and neg_div.shape == (B,)
    assert jnp.allclose(dx, dx_ref, atol=1e-5, rtol=1e-5)
    assert jnp.allclose(neg_div, neg_div_ref, atol=1e-4, rtol=1e-4)
    print("KERNEL_OK")
</pallas_src>

<mosaic_0001>
module attributes {stable_mosaic.version = 11 : i64} {
  func.func @_cnf_kernel(%arg0: i32, %arg1: memref<8x32xf32, #tpu.memory_space<vmem>>, %arg2: memref<8x32xf32, #tpu.memory_space<vmem>>, %arg3: memref<32x64xf32, #tpu.memory_space<vmem>>, %arg4: memref<32x64xf32, #tpu.memory_space<vmem>>, %arg5: memref<64x32xf32, #tpu.memory_space<vmem>>, %arg6: memref<1x64xf32, #tpu.memory_space<vmem>>, %arg7: memref<1x32xf32, #tpu.memory_space<vmem>>, %arg8: memref<8x32xf32, #tpu.memory_space<vmem>>, %arg9: memref<8x1xf32, #tpu.memory_space<vmem>>) attributes {dimension_semantics = [#tpu.dimension_semantics<parallel>], iteration_bounds = array<i64: 1>, scalar_prefetch = 0 : i64, scratch_operands = 0 : i64, tpu.core_type = #tpu.core_type<tc>, window_params = [{transform_indices = @transform_0, window_bounds = array<i64: 8, 32>}, {transform_indices = @transform_1, window_bounds = array<i64: 8, 32>}, {pipeline_mode = #tpu.pipeline_mode<synchronous>, transform_indices = @transform_2, window_bounds = array<i64: 32, 64>}, {pipeline_mode = #tpu.pipeline_mode<synchronous>, transform_indices = @transform_3, window_bounds = array<i64: 32, 64>}, {pipeline_mode = #tpu.pipeline_mode<synchronous>, transform_indices = @transform_4, window_bounds = array<i64: 64, 32>}, {pipeline_mode = #tpu.pipeline_mode<synchronous>, transform_indices = @transform_5, window_bounds = array<i64: 1, 64>}, {pipeline_mode = #tpu.pipeline_mode<synchronous>, transform_indices = @transform_6, window_bounds = array<i64: 1, 32>}, {transform_indices = @transform_7, window_bounds = array<i64: 8, 32>}, {transform_indices = @transform_8, window_bounds = array<i64: 8, 1>}]} {
    %c0 = arith.constant 0 : index
    %c0_0 = arith.constant 0 : index
    %0 = vector.load %arg1[%c0, %c0_0] : memref<8x32xf32, #tpu.memory_space<vmem>>, vector<8x32xf32>
    %c0_1 = arith.constant 0 : index
    %c0_2 = arith.constant 0 : index
    %1 = vector.load %arg2[%c0_1, %c0_2] : memref<8x32xf32, #tpu.memory_space<vmem>>, vector<8x32xf32>
    %c0_3 = arith.constant 0 : index
    %c0_4 = arith.constant 0 : index
    %2 = vector.load %arg3[%c0_3, %c0_4] : memref<32x64xf32, #tpu.memory_space<vmem>>, vector<32x64xf32>
    %c0_5 = arith.constant 0 : index
    %c0_6 = arith.constant 0 : index
    %3 = vector.load %arg4[%c0_5, %c0_6] : memref<32x64xf32, #tpu.memory_space<vmem>>, vector<32x64xf32>
    %c0_7 = arith.constant 0 : index
    %c0_8 = arith.constant 0 : index
    %4 = vector.load %arg5[%c0_7, %c0_8] : memref<64x32xf32, #tpu.memory_space<vmem>>, vector<64x32xf32>
    %cst = arith.constant dense<0.000000e+00> : vector<8x64xf32>
    %5 = tpu.matmul %0, %2, %cst {dimension_numbers = #tpu.dot_dimension_numbers<[1], [0], [0], [1], [0, 0, 1, 1], [], []>} : vector<8x32xf32>, vector<32x64xf32>, vector<8x64xf32> -> vector<8x64xf32>
    %c0_9 = arith.constant 0 : index
    %c0_10 = arith.constant 0 : index
    %6 = vector.load %arg6[%c0_9, %c0_10] : memref<1x64xf32, #tpu.memory_space<vmem>>, vector<1x64xf32>
    %7 = vector.broadcast %6 : vector<1x64xf32> to vector<8x64xf32>
    %8 = arith.addf %5, %7 : vector<8x64xf32>
    %cst_11 = arith.constant dense<0.000000e+00> : vector<8x64xf32>
    %9 = tpu.matmul %1, %2, %cst_11 {dimension_numbers = #tpu.dot_dimension_numbers<[1], [0], [0], [1], [0, 0, 1, 1], [], []>} : vector<8x32xf32>, vector<32x64xf32>, vector<8x64xf32> -> vector<8x64xf32>
    %cst_12 = arith.constant dense<0.000000e+00> : vector<8x64xf32>
    %10 = tpu.matmul %1, %3, %cst_12 {dimension_numbers = #tpu.dot_dimension_numbers<[1], [0], [0], [1], [0, 0, 1, 1], [], []>} : vector<8x32xf32>, vector<32x64xf32>, vector<8x64xf32> -> vector<8x64xf32>
    %11 = math.tanh %8 : vector<8x64xf32>
    %12 = arith.mulf %11, %11 : vector<8x64xf32>
    %cst_13 = arith.constant 1.000000e+00 : f32
    %13 = vector.broadcast %cst_13 : f32 to vector<8x64xf32>
    %14 = arith.subf %13, %12 : vector<8x64xf32>
    %15 = arith.mulf %10, %14 : vector<8x64xf32>
    %cst_14 = arith.constant dense<0.000000e+00> : vector<8x32xf32>
    %16 = tpu.matmul %11, %4, %cst_14 {dimension_numbers = #tpu.dot_dimension_numbers<[1], [0], [0], [1], [0, 0, 1, 1], [], []>} : vector<8x64xf32>, vector<64x32xf32>, vector<8x32xf32> -> vector<8x32xf32>
    %c0_15 = arith.constant 0 : index
    %c0_16 = arith.constant 0 : index
    %17 = vector.load %arg7[%c0_15, %c0_16] : memref<1x32xf32, #tpu.memory_space<vmem>>, vector<1x32xf32>
    %18 = vector.broadcast %17 : vector<1x32xf32> to vector<8x32xf32>
    %19 = arith.addf %16, %18 : vector<8x32xf32>
    %c0_17 = arith.constant 0 : index
    %c0_18 = arith.constant 0 : index
    %20 = vector.load %arg8[%c0_17, %c0_18] : memref<8x32xf32, #tpu.memory_space<vmem>>, vector<8x32xf32>
    tpu.vector_store %arg8[%c0_17, %c0_18], %19 {strides = array<i32>} : memref<8x32xf32, #tpu.memory_space<vmem>>, vector<8x32xf32>,
    %21 = arith.mulf %15, %9 : vector<8x64xf32>
    %cst_19 = arith.constant dense<0.000000e+00> : vector<8xf32>
    %22 = vector.multi_reduction <add>, %21, %cst_19 [1] : vector<8x64xf32> to vector<8xf32>
    %23 = vector.shape_cast %22 : vector<8xf32> to vector<8x1xf32>
    %cst_20 = arith.constant 0.000000e+00 : f32
    %24 = vector.broadcast %cst_20 : f32 to vector<8x1xf32>
    %25 = arith.subf %24, %23 : vector<8x1xf32>
    %c0_21 = arith.constant 0 : index
    %c0_22 = arith.constant 0 : index
    %26 = vector.load %arg9[%c0_21, %c0_22] : memref<8x1xf32, #tpu.memory_space<vmem>>, vector<8x1xf32>
    tpu.vector_store %arg9[%c0_21, %c0_22], %25 {strides = array<i32>} : memref<8x1xf32, #tpu.memory_space<vmem>>, vector<8x1xf32>,
    return
  }
  func.func @transform_0(%arg0: i32) -> (i32, i32) {
    %c0_i32 = arith.constant 0 : i32
    %c0_i32_0 = arith.constant 0 : i32
    return %arg0, %c0_i32 : i32, i32
  }
  func.func @transform_1(%arg0: i32) -> (i32, i32) {
    %c0_i32 = arith.constant 0 : i32
    %c0_i32_0 = arith.constant 0 : i32
    return %arg0, %c0_i32 : i32, i32
  }
  func.func @transform_2(%arg0: i32) -> (i32, i32) {
    %c0_i32 = arith.constant 0 : i32
    %c0_i32_0 = arith.constant 0 : i32
    %c0_i32_1 = arith.constant 0 : i32
    return %c0_i32, %c0_i32_0 : i32, i32
  }
  func.func @transform_3(%arg0: i32) -> (i32, i32) {
    %c0_i32 = arith.constant 0 : i32
    %c0_i32_0 = arith.constant 0 : i32
    %c0_i32_1 = arith.constant 0 : i32
    return %c0_i32, %c0_i32_0 : i32, i32
  }
  func.func @transform_4(%arg0: i32) -> (i32, i32) {
    %c0_i32 = arith.constant 0 : i32
    %c0_i32_0 = arith.constant 0 : i32
    %c0_i32_1 = arith.constant 0 : i32
    return %c0_i32, %c0_i32_0 : i32, i32
  }
  func.func @transform_5(%arg0: i32) -> (i32, i32) {
    %c0_i32 = arith.constant 0 : i32
    %c0_i32_0 = arith.constant 0 : i32
    %c0_i32_1 = arith.constant 0 : i32
    return %c0_i32, %c0_i32_0 : i32, i32
  }
  func.func @transform_6(%arg0: i32) -> (i32, i32) {
    %c0_i32 = arith.constant 0 : i32
    %c0_i32_0 = arith.constant 0 : i32
    %c0_i32_1 = arith.constant 0 : i32
    return %c0_i32, %c0_i32_0 : i32, i32
  }
  func.func @transform_7(%arg0: i32) -> (i32, i32) {
    %c0_i32 = arith.constant 0 : i32
    %c0_i32_0 = arith.constant 0 : i32
    return %arg0, %c0_i32 : i32, i32
  }
  func.func @transform_8(%arg0: i32) -> (i32, i32) {
    %c0_i32 = arith.constant 0 : i32
    %c0_i32_0 = arith.constant 0 : i32
    return %arg0, %c0_i32 : i32, i32
  }
}

</mosaic_0001>

<bundles_post_ra>
// kernel: ode_func_with_logdet.1
= control target key start
LH: loop header
LB: loop body
LE: loop exit
PB: predicated region body
PF: predicated region fallthrough
CT: control target
= control target key end

     0   :  { %v491_v1 = vmov 0.0   ;;  %vm492_vm0 = vmmov 0   ;;  %s637_s0 = inlined_call_operand.vmem [shape: f32[8,32], index: 0, kind: input, shape index: {}]   ;;  %s638_s1 = inlined_call_operand.vmem [shape: f32[8,32], index: 1, kind: input, shape index: {}]   ;;  %s639_s2 = inlined_call_operand.vmem [shape: f32[32,64], index: 2, kind: input, shape index: {}]   ;;  %s640_s3 = inlined_call_operand.vmem [shape: f32[32,64], index: 3, kind: input, shape index: {}]   ;;  %s641_s4 = inlined_call_operand.vmem [shape: f32[64,32], index: 4, kind: input, shape index: {}]   ;;  %s642_s5 = inlined_call_operand.vmem [shape: f32[1,64], index: 5, kind: input, shape index: {}]   ;;  %s643_s6 = inlined_call_operand.vmem [shape: f32[1,32], index: 6, kind: input, shape index: {}]   ;;  %s644_s7 = inlined_call_operand.hbm [shape: f32[8,32], index: 7, kind: output, shape index: {0}]   ;;  %s645_s8 = inlined_call_operand.vmem [shape: f32[8,1], index: 8, kind: output, shape index: {1}]  }
   0x1   :  { %v34_v0 = vld [vmem:[%s639_s2 + $0x18] sm:$0xff]  ;;  %412 = vmatprep.subr.mxu0 %v491_v1  ;;  %v33_v2 = vld [vmem:[%s639_s2 + $0x10] sm:$0xff]  ;;  %420 = vmatprep.mubr.msk.f32.mxu0 %vm492_vm0, %v491_v1  ;;  %v32_v3 = vld [vmem:[%s639_s2 + $0x8] sm:$0xff] }
   0x2   :  { %413 = vmatpush3.msra.mxu0 %v34_v0  ;;  %423 = vmatprep.subr.mxu1 %v491_v1 }
   0x3   :  { %414 = vmatprep.subr.mxu0 %v491_v1  ;;  %424 = vmatpush3.msra.mxu1 %v34_v0 }
   0x4   :  { %14 = vsyncpa [#allocation3], 0  ;;  %415 = vmatpush3.msra.mxu0 %v33_v2  ;;  %425 = vmatprep.subr.mxu1 %v491_v1  ;;  %v31_v4 = vld [vmem:[%s639_s2] sm:$0xff]  ;;  %vm54_vm1 = vcmask 261120   ;;  %v38_v6 = vld [vmem:[%s640_s3 + $0x18] sm:$0xff]  ;;  %vm282_vm2 = vcmask 523264  }
   0x5   :  { %416 = vmatprep.subr.mxu0 %v491_v1  ;;  %426 = vmatpush3.msra.mxu1 %v33_v2  ;;  %v29_v5 = vld [vmem:[%s637_s0] sm:$0xff]  ;;  %v37_v7 = vld [vmem:[%s640_s3 + $0x10] sm:$0xff]  ;;  %v36_v8 = vld [vmem:[%s640_s3 + $0x8] sm:$0xff]  ;;  %vm362_vm3 = vcmask 7168   ;;  %s493_s0 = smov [#allocation2]  }
   0x6   :  { %417 = vmatpush3.msra.mxu0 %v32_v3  ;;  %427 = vmatprep.subr.mxu1 %v491_v1  ;;  %v30_v9 = vld [vmem:[%s638_s1] sm:$0xff]  ;;  %v46_v11 = vld [vmem:[%s641_s4 + $0x38] sm:$0xff]  ;;  %v45_v12 = vld [vmem:[%s641_s4 + $0x30] sm:$0xff]  ;;  %s370_s18 = sshll.u32 %s493_s0, 4  ;;  %s371_s18 = int_to_ptr.vmem [resolvable:$true] %s370_s18 }
   0x7   :  { %418 = vmatprep.subr.mxu0 %v491_v1  ;;  %428 = vmatpush3.msra.mxu1 %v32_v3  ;;  %v35_v10 = vld [vmem:[%s640_s3] sm:$0xff]  ;;  %v44_v13 = vld [vmem:[%s641_s4 + $0x28] sm:$0xff]  ;;  %v42_v15 = vld [vmem:[%s641_s4 + $0x18] sm:$0xff]  ;;  %s469_s19 = scalar_lea.vmem %s371_s18, 128  ;;  %p474_p1 = scmp.lt.s32.totalorder %s371_s18, %s371_s18 }
   0x8   :  { %419 = vmatpush3.msra.mxu0 %v31_v4  ;;  %429 = vmatprep.subr.mxu1 %v491_v1  ;;  %v43_v14 = vld [vmem:[%s641_s4 + $0x20] sm:$0xff]  ;;  %v41_v16 = vld [vmem:[%s641_s4 + $0x10] sm:$0xff]  ;;  %v40_v17 = vld [vmem:[%s641_s4 + $0x8] sm:$0xff]  ;;  %p470_p0 = scmp.ne.s32.totalorder %s371_s18, %s469_s19  ;;  %p475_p2 = scmp.lt.s32.totalorder %s469_s19, %s469_s19 }
   0x9   :  { %421 = vmatmul.mubr.msk.f32.vlgmr.msra.gmra.mxu0 %vm54_vm1, %v29_v5  ;;  %434 = vmatprep.subr.mxu0 %v491_v1  ;;  %v39_v18 = vld [vmem:[%s641_s4] sm:$0xff] }
   0xa   :  { %435 = vmatpush3.msra.mxu0 %v38_v6  ;;  %442 = vmatprep.mubr.msk.f32.mxu0 %vm492_vm0, %v491_v1  ;;  %v382_v19 = vld [vmem:[%s642_s5] ss:$0 sm:$0xff]  ;;  %p476_p3 = por %p475_p2, %p474_p1 }
   0xb   :  { %436 = vmatprep.subr.mxu0 %v491_v1  ;;  %430 = vmatpush3.msra.mxu1 %v31_v4  ;;  %v386_v35 = vld [vmem:[%s643_s6] ss:$0 sm:$0xff] }
   0xc   :  { %437 = vmatpush3.msra.mxu0 %v37_v7  ;;  %431 = vmatprep.mubr.msk.f32.mxu1 %vm492_vm0, %v491_v1  ;;  %p477_p4 = pnand %p476_p3, %p470_p0 }
   0xd   :  { %438 = vmatprep.subr.mxu0 %v491_v1  ;;  %432 = vmatmul.mubr.msk.f32.vlgmr.msra.gmra.mxu1 %vm54_vm1, %v30_v9 }
   0xe   :  { %439 = vmatpush3.msra.mxu0 %v36_v8  ;;  %445 = vmatprep.subr.mxu1 %v491_v1 }
   0xf   :  { %440 = vmatprep.subr.mxu0 %v491_v1  ;;  %461 = vmatprep.mubr.msk.f32.mxu1 %vm492_vm0, %v491_v1 }
  0x10   :  { %441 = vmatpush3.msra.mxu0 %v35_v10  ;;  %446 = vmatpush3.msra.mxu1 %v46_v11 }
  0x11   :  { %443 = vmatmul.mubr.msk.f32.vlgmr.msra.gmra.mxu0 %vm54_vm1, %v30_v9  ;;  %447 = vmatprep.subr.mxu1 %v491_v1 }
  0x12   :  { %448 = vmatpush3.msra.mxu1 %v45_v12 }
  0x13   :  { %449 = vmatprep.subr.mxu1 %v491_v1 }
  0x14   :  { %450 = vmatpush3.msra.mxu1 %v44_v13 }
  0x15   :  { %451 = vmatprep.subr.mxu1 %v491_v1 }
  0x16   :  { %452 = vmatpush3.msra.mxu1 %v43_v14 }
  0x17   :  { %453 = vmatprep.subr.mxu1 %v491_v1 }
  0x18   :  { %454 = vmatpush3.msra.mxu1 %v42_v15 }
  0x19   :  { %455 = vmatprep.subr.mxu1 %v491_v1 }
  0x1a   :  { %456 = vmatpush3.msra.mxu1 %v41_v16 }
  0x1b   :  { %457 = vmatprep.subr.mxu1 %v491_v1 }
  0x1c   :  { %458 = vmatpush3.msra.mxu1 %v40_v17 }
  0x1d   :  { %459 = vmatprep.subr.mxu1 %v491_v1 }
  0x1e   :  { %460 = vmatpush3.msra.mxu1 %v39_v18 }
  0xc9   :  { %v124_v20 = vpop.f32.mrf.mxu0 }
  0xca   :  { %v125_v21 = vadd.f32 %v382_v19, %v124_v20 }
  0xcb   :  { %v422_v22 = vpop.f32.mrf.mxu0 }
  0xcc   :  { %467 = vtanh.f32 %v125_v21 }
  0xcd   :  { %v197_v23 = vpop.f32.mrf.mxu1 }
  0xcf   :  { %v433_v24 = vpop.f32.mrf.mxu1 }
  0xd1   :  { %v267_v25 = vpop.f32.mrf.mxu0 }
  0xd3   :  { %v444_v26 = vpop.f32.mrf.mxu0 }
  0xd9   :  { %v468_v27 = vpop.eup %467 }
  0xda   :  { %462 = vmatmul.mubr.msk.f32.vlgmr.msra.gmra.mxu1 %vm282_vm2, %v468_v27  ;;  %v272_v28 = vmul.f32 %v468_v27, %v468_v27 }
  0xdc   :  { %v273_v29 = vsub.f32 1.0, %v272_v28 }
  0xde   :  { %v274_v30 = vmul.f32 %v273_v29, %v267_v25 }
  0xe0   :  { %v357_v31 = vmul.f32 %v274_v30, %v197_v23 }
  0xe2   :  { %v358_v32 = vsel %vm282_vm2, %v357_v31, 0.0 }
  0xe3   :  { %359 = vadd.xlane.f32.xlu0 %v358_v32 }
 0x16c   :  { %v360_v33 = vpop.xlane.xlu0 %359 }
 0x16d   :  { %v361_v34 = vsub.f32 0.0, %v360_v33 }
 0x16f   :  { %363 = vst.msk [vmem:[%s645_s8] sm:$0xff] %vm362_vm3, %v361_v34 }
 0x19a   :  { %v352_v36 = vpop.f32.mrf.mxu1 }
 0x19b   :  { %v353_v37 = vadd.f32 %v386_v35, %v352_v36 }
 0x19c   :  { %v463_v38 = vpop.f32.mrf.mxu1 }
 0x19d   :  { %356 = vst.msk [vmem:[#allocation2] sm:$0xff] %vm54_vm1, %v353_v37 }
 0x19e   :  { %480 = shalt.err (!%p477_p4)
}
 0x19f   :  { %373 = dma.vmem_to_hbm [thread:$0]  %s371_s18, 128, %s644_s7, [#allocation3]  }
 0x1a0   :  { %489 = dma.done.wait [#allocation3], 128  }
 0x1a1   :  { %490 = vsyncadd [#allocation3], 4294967168 }
 0x1a2   :  { %381 = vsyncpa [#allocation3], 1 }

</bundles_post_ra>
